<compile_context>
chip_gen: v7x
topology: tpu7x:2x2x1
jax: 0.10.0
libtpu: 0.0.40
codegen_flags: <defaults>
</compile_context>

<pallas_src>
import functools
import math

import jax
import jax.numpy as jnp
from jax.experimental import pallas as pl
from jax.experimental.pallas import tpu as pltpu


# =============================================================================
# helpers
# =============================================================================

def _round_up(x, m):
    return ((x + m - 1) // m) * m


def _cdiv(a, b):
    return -(-a // b)


@functools.lru_cache(maxsize=1)
def _vmem_budget_bytes():
    """Generation-aware scoped-VMEM budget.

    v7x (64 MiB physical) -> 48 MiB; v5e/v6e (128 MiB) -> 100 MiB.  Leaves
    headroom for Mosaic internal scratch / pipeline bookkeeping.
    """
    try:
        cap = int(pltpu.get_tpu_info().vmem_capacity_bytes)
    except Exception:
        cap = 64 * 1024 * 1024  # conservative (v7x-sized) fallback
    return max(32 * 1024 * 1024, min(cap - 16 * 1024 * 1024, (cap * 25) // 32))


# =============================================================================
# in-kernel exact-erf GELU (torch.nn.GELU() default)
# =============================================================================

def _erf_f32(x):
    """float32-accurate erf (XLA ErfImpl32 rational polynomial)."""
    x = jnp.clip(x, -4.0, 4.0)
    x2 = x * x
    # numerator P(x2), Horner, highest degree first
    alpha = jnp.float32(-2.72614225801306e-10)
    alpha = alpha * x2 + jnp.float32(2.77068142495902e-08)
    alpha = alpha * x2 + jnp.float32(-2.10102402082508e-06)
    alpha = alpha * x2 + jnp.float32(-5.69250639462346e-05)
    alpha = alpha * x2 + jnp.float32(-7.34990630326855e-04)
    alpha = alpha * x2 + jnp.float32(-2.95459980854025e-03)
    alpha = alpha * x2 + jnp.float32(-1.60960333262415e-02)
    # denominator Q(x2) -- strictly negative, never zero
    beta = jnp.float32(-1.45660718464996e-05)
    beta = beta * x2 + jnp.float32(-2.13374055278905e-04)
    beta = beta * x2 + jnp.float32(-1.68282697438203e-03)
    beta = beta * x2 + jnp.float32(-7.37332916720468e-03)
    beta = beta * x2 + jnp.float32(-1.42647390514189e-02)
    # EUP approx reciprocal + one Newton step: keeps the divide off the VALU
    # slot while recovering ~f32 accuracy.
    r = pl.reciprocal(beta, approx=True)
    r = r * (jnp.float32(2.0) - beta * r)
    return x * alpha * r


def _gelu_exact(x):
    # torch.nn.GELU() default: 0.5 * x * (1 + erf(x / sqrt(2)))
    inv_sqrt2 = jnp.float32(0.7071067811865476)
    return jnp.float32(0.5) * x * (jnp.float32(1.0) + _erf_f32(x * inv_sqrt2))


# =============================================================================
# kernels
# =============================================================================

def _mlp_kernel_fused(x_ref, w1_ref, b1_ref, w2_ref, b2_ref, o_ref):
    """Weight-resident path (k_tiles == 1): write output directly, no scratch."""
    h = jnp.dot(x_ref[...].astype(w1_ref.dtype), w1_ref[...],
                preferred_element_type=jnp.float32)
    h = _gelu_exact(h + b1_ref[...])            # f32 bias + GELU; drop(p=0) == id
    out = jnp.dot(h.astype(w2_ref.dtype), w2_ref[...],
                  preferred_element_type=jnp.float32)
    o_ref[...] = (out + b2_ref[...]).astype(o_ref.dtype)


def _mlp_kernel_ktiled(x_ref, w1_ref, b1_ref, w2_ref, b2_ref, o_ref, acc_ref):
    """Fallback: hidden dim streamed in chunks; grid = (row_tiles, k_tiles)."""
    k = pl.program_id(1)

    @pl.when(k == 0)
    def _():
        acc_ref[...] = jnp.zeros_like(acc_ref)

    h = jnp.dot(x_ref[...].astype(w1_ref.dtype), w1_ref[...],
                preferred_element_type=jnp.float32)
    h = _gelu_exact(h + b1_ref[...])
    acc_ref[...] += jnp.dot(h.astype(w2_ref.dtype), w2_ref[...],
                            preferred_element_type=jnp.float32)

    @pl.when(k == pl.num_programs(1) - 1)
    def _():
        o_ref[...] = (acc_ref[...] + b2_ref[...]).astype(o_ref.dtype)


# =============================================================================
# tiling selection
# =============================================================================

def _vmem_footprint_bytes(bm, tk, c_in_p, c_out_p, x_bytes, w_bytes, k_tiles):
    f = 0
    f += 2 * bm * c_in_p * x_bytes        # x tile (double-buffered)
    f += 2 * c_in_p * tk * w_bytes        # W1 (chunk)
    f += 2 * 8 * tk * 4                   # b1 (sublane-padded to 8 rows, f32)
    f += 2 * tk * c_out_p * w_bytes       # W2 (chunk)
    f += 2 * 8 * c_out_p * 4              # b2 (sublane-padded, f32)
    f += 2 * bm * c_out_p * x_bytes       # output tile
    if k_tiles > 1:
        f += bm * c_out_p * 4             # f32 accumulator scratch
    # in-kernel temporaries: cast x, f32 h, cast h, f32 pre-cast output
    f += bm * c_in_p * w_bytes
    f += bm * tk * (4 + w_bytes)
    f += bm * c_out_p * 4
    return f


def _select_tiles(n, c_in_p, c_hid_p, c_out_p, x_bytes, w_bytes,
                  block_rows, budget, hidden_tile):
    bm_max = min(block_rows, _round_up(max(n, 1), 8))
    bm_cands = sorted({bm_max, min(bm_max, 256), min(bm_max, 128)}, reverse=True)

    # 1) weight-resident fast path: tk == c_hid_p (weights DMA'd exactly once)
    if hidden_tile is None or hidden_tile >= c_hid_p:
        for bm in bm_cands:
            if _vmem_footprint_bytes(bm, c_hid_p, c_in_p, c_out_p,
                                     x_bytes, w_bytes, 1) <= budget:
                return bm, c_hid_p

    # 2) fallback: stream hidden dim with the largest 128-multiple chunk that
    #    divides c_hid_p and fits (very wide MLPs / user-capped hidden_tile)
    bm = bm_cands[-1]
    cap = c_hid_p if hidden_tile is None else min(hidden_tile, c_hid_p)
    tk = 128
    t = max(128, (cap // 128) * 128)
    while t >= 128:
        if c_hid_p % t == 0 and _vmem_footprint_bytes(
                bm, t, c_in_p, c_out_p, x_bytes, w_bytes, 2) <= budget:
            tk = t
            break
        t -= 128
    return bm, tk


# =============================================================================
# pallas_call wrappers
# =============================================================================

@functools.partial(jax.jit, static_argnames=("c_out", "bm", "vmem_limit"))
def _mlp_fused(x, w1p, b1p, w2p, b2p, *, c_out, bm, vmem_limit):
    lead = x.shape[:-1]
    c_in = x.shape[-1]
    c_in_p, c_hid_p = w1p.shape
    c_out_p = w2p.shape[1]
    x2d = x.reshape(-1, c_in)
    n = x2d.shape[0]
    if c_in_p != c_in:
        x2d = jnp.pad(x2d, ((0, 0), (0, c_in_p - c_in)))

    out = pl.pallas_call(
        _mlp_kernel_fused,
        out_shape=jax.ShapeDtypeStruct((n, c_out_p), x.dtype),
        grid_spec=pltpu.PrefetchScalarGridSpec(
            num_scalar_prefetch=0,
            grid=(_cdiv(n, bm),),
            in_specs=[
                pl.BlockSpec((bm, c_in_p), lambda i: (i, 0)),        # x tile
                pl.BlockSpec((c_in_p, c_hid_p), lambda i: (0, 0)),   # W1 (resident)
                pl.BlockSpec((1, c_hid_p), lambda i: (0, 0)),        # b1
                pl.BlockSpec((c_hid_p, c_out_p), lambda i: (0, 0)),  # W2 (resident)
                pl.BlockSpec((1, c_out_p), lambda i: (0, 0)),        # b2
            ],
            out_specs=pl.BlockSpec((bm, c_out_p), lambda i: (i, 0)),
        ),
        compiler_params=pltpu.CompilerParams(
            dimension_semantics=("parallel",),
            vmem_limit_bytes=vmem_limit,
        ),
    )(x2d, w1p, b1p, w2p, b2p)
    return out[:, :c_out].reshape(*lead, c_out)


@functools.partial(jax.jit, static_argnames=("c_out", "bm", "tk", "vmem_limit"))
def _mlp_ktiled(x, w1p, b1p, w2p, b2p, *, c_out, bm, tk, vmem_limit):
    lead = x.shape[:-1]
    c_in = x.shape[-1]
    c_in_p, c_hid_p = w1p.shape
    c_out_p = w2p.shape[1]
    x2d = x.reshape(-1, c_in)
    n = x2d.shape[0]
    if c_in_p != c_in:
        x2d = jnp.pad(x2d, ((0, 0), (0, c_in_p - c_in)))
    k_tiles = c_hid_p // tk

    out = pl.pallas_call(
        _mlp_kernel_ktiled,
        out_shape=jax.ShapeDtypeStruct((n, c_out_p), x.dtype),
        grid_spec=pltpu.PrefetchScalarGridSpec(
            num_scalar_prefetch=0,
            grid=(_cdiv(n, bm), k_tiles),
            in_specs=[
                pl.BlockSpec((bm, c_in_p), lambda i, k: (i, 0)),     # x tile
                pl.BlockSpec((c_in_p, tk), lambda i, k: (0, k)),     # W1 chunk
                pl.BlockSpec((1, tk), lambda i, k: (0, k)),          # b1 chunk
                pl.BlockSpec((tk, c_out_p), lambda i, k: (k, 0)),    # W2 chunk
                pl.BlockSpec((1, c_out_p), lambda i, k: (0, 0)),     # b2
            ],
            out_specs=pl.BlockSpec((bm, c_out_p), lambda i, k: (i, 0)),
            scratch_shapes=[pltpu.VMEM((bm, c_out_p), jnp.float32)],
        ),
        compiler_params=pltpu.CompilerParams(
            dimension_semantics=("parallel", "arbitrary"),
            vmem_limit_bytes=vmem_limit,
        ),
    )(x2d, w1p, b1p, w2p, b2p)
    return out[:, :c_out].reshape(*lead, c_out)


# =============================================================================
# public API
# =============================================================================

def prepare_mlp_params(w1, b1, w2, b2, compute_dtype=jnp.bfloat16):
    """One-time weight prep (pad to lane-dense 128 multiples + cast MXU operands),
    hoisted out of the per-call forward path.

    w1: (C_in, C_hid), b1: (C_hid,), w2: (C_hid, C_out), b2: (C_out,)
    (transposed vs torch's (out, in)).  compute_dtype is the MXU operand dtype
    (bf16 is the fast path on v5e/v6e/v7x); accumulation, bias adds and GELU
    always run in f32.
    """
    c_in, c_hid = w1.shape
    c_hid2, c_out = w2.shape
    assert c_hid2 == c_hid
    c_in_p = _round_up(c_in, 128)
    c_hid_p = _round_up(c_hid, 128)
    c_out_p = _round_up(c_out, 128)
    w1p = jnp.pad(w1, ((0, c_in_p - c_in), (0, c_hid_p - c_hid))).astype(compute_dtype)
    b1p = jnp.pad(b1, (0, c_hid_p - c_hid)).astype(jnp.float32).reshape(1, c_hid_p)
    w2p = jnp.pad(w2, ((0, c_hid_p - c_hid), (0, c_out_p - c_out))).astype(compute_dtype)
    b2p = jnp.pad(b2, (0, c_out_p - c_out)).astype(jnp.float32).reshape(1, c_out_p)
    return {"w1": w1p, "b1": b1p, "w2": w2p, "b2": b2p,
            "c_in": c_in, "c_hid": c_hid, "c_out": c_out}


def mlp_forward(x, params, *, block_rows=None, hidden_tile=None):
    """x: (..., C_in).  params: output of prepare_mlp_params().
    Computes GELU(x @ W1 + b1) @ W2 + b2 (dropout p=0.0 == identity)."""
    w1p, b1p, w2p, b2p = params["w1"], params["b1"], params["w2"], params["b2"]
    c_in, c_out = params["c_in"], params["c_out"]
    assert x.shape[-1] == c_in
    n = math.prod(x.shape[:-1]) if x.ndim > 1 else 1
    c_in_p, c_hid_p = w1p.shape
    c_out_p = w2p.shape[1]

    budget = _vmem_budget_bytes()
    if block_rows is None:
        # bigger row tiles on 128-MiB-VMEM parts (v5e/v6e); 256 on v7x
        block_rows = 512 if budget >= 96 * 1024 * 1024 else 256

    x_bytes = jnp.dtype(x.dtype).itemsize
    w_bytes = jnp.dtype(w1p.dtype).itemsize
    bm, tk = _select_tiles(n, c_in_p, c_hid_p, c_out_p, x_bytes, w_bytes,
                           block_rows, budget, hidden_tile)

    # feed both TensorCores (v7x) when a single row tile would cover all tokens
    if _cdiv(n, bm) == 1 and n > 8:
        bm = _round_up(_cdiv(n, 2), 8)

    if tk == c_hid_p:
        return _mlp_fused(x, w1p, b1p, w2p, b2p,
                          c_out=c_out, bm=bm, vmem_limit=budget)
    return _mlp_ktiled(x, w1p, b1p, w2p, b2p,
                       c_out=c_out, bm=bm, tk=tk, vmem_limit=budget)


def init_mlp_params(key, in_channels, hidden_channels=None, out_channels=None):
    """Deterministic init mirroring nn.Linear's U(-1/sqrt(fan_in), 1/sqrt(fan_in))."""
    out_channels = out_channels or in_channels
    hidden_channels = hidden_channels or in_channels
    k1, k2, k3, k4 = jax.random.split(key, 4)
    bound1 = 1.0 / (in_channels ** 0.5)
    bound2 = 1.0 / (hidden_channels ** 0.5)
    # stored transposed vs torch's (out, in): kernel uses x @ W
    w1 = jax.random.uniform(k1, (in_channels, hidden_channels), jnp.float32, -bound1, bound1)
    b1 = jax.random.uniform(k2, (hidden_channels,), jnp.float32, -bound1, bound1)
    w2 = jax.random.uniform(k3, (hidden_channels, out_channels), jnp.float32, -bound2, bound2)
    b2 = jax.random.uniform(k4, (out_channels,), jnp.float32, -bound2, bound2)
    return w1, b1, w2, b2


def mlp_reference(x, w1, b1, w2, b2):
    hp = jax.lax.Precision.HIGHEST
    h = jnp.dot(x, w1, precision=hp) + b1
    h = jax.nn.gelu(h, approximate=False)   # torch.nn.GELU() default (exact erf)
    return jnp.dot(h, w2, precision=hp) + b2


if __name__ == "__main__":
    key = jax.random.PRNGKey(0)
    kx, kp, kx2, kp2 = jax.random.split(key, 4)

    # TODO(synk): dropout with p>0 in training mode not implemented in-kernel;
    # the module default p=0.0 is the identity, matching this eval-mode forward.

    # Case 1: small shapes consistent with the module (batch, seq, channels)
    batch, seq, c_in, c_hid, c_out = 2, 8, 32, 64, 32
    x = jax.random.normal(kx, (batch, seq, c_in), dtype=jnp.float32)
    w1, b1, w2, b2 = init_mlp_params(kp, c_in, hidden_channels=c_hid, out_channels=c_out)
    ref = mlp_reference(x, w1, b1, w2, b2)

    # default path: bf16 MXU operands, f32 accumulation / bias / GELU
    params_bf16 = prepare_mlp_params(w1, b1, w2, b2)
    out_bf16 = jax.block_until_ready(mlp_forward(x, params_bf16))
    assert out_bf16.shape == (batch, seq, c_out)
    assert jnp.allclose(out_bf16, ref, atol=5e-2, rtol=5e-2), "bf16 mismatch vs reference"

    # f32 operand path (tighter tolerance)
    params_f32 = prepare_mlp_params(w1, b1, w2, b2, compute_dtype=jnp.float32)
    out_f32 = jax.block_until_ready(mlp_forward(x, params_f32))
    assert jnp.allclose(out_f32, ref, atol=5e-3, rtol=5e-3), "f32 mismatch vs reference"

    # Case 2: partial row tiles, c_in/c_out padding, weight-resident fast path
    bt, st, ci2, ch2, co2 = 3, 100, 64, 256, 48
    x2 = jax.random.normal(kx2, (bt, st, ci2), dtype=jnp.float32)
    w1b, b1b, w2b, b2b = init_mlp_params(kp2, ci2, hidden_channels=ch2, out_channels=co2)
    ref2 = mlp_reference(x2, w1b, b1b, w2b, b2b)
    params2 = prepare_mlp_params(w1b, b1b, w2b, b2b, compute_dtype=jnp.float32)
    out2 = jax.block_until_ready(mlp_forward(x2, params2))
    assert out2.shape == (bt, st, co2)
    assert jnp.allclose(out2, ref2, atol=5e-3, rtol=5e-3), "case-2 mismatch vs reference"

    # Case 3: force the hidden-dim-streaming (k-tiled accumulator) fallback path
    out3 = jax.block_until_ready(mlp_forward(x2, params2, hidden_tile=128, block_rows=128))
    assert jnp.allclose(out3, ref2, atol=5e-3, rtol=5e-3), "k-tiled mismatch vs reference"

    print("KERNEL_OK")
</pallas_src>

<mosaic_0001>
module attributes {stable_mosaic.version = 11 : i64} {
  func.func @_mlp_kernel_fused(%arg0: i32, %arg1: memref<8x128xf32, #tpu.memory_space<vmem>>, %arg2: memref<128x128xbf16, #tpu.memory_space<vmem>>, %arg3: memref<1x128xf32, #tpu.memory_space<vmem>>, %arg4: memref<128x128xbf16, #tpu.memory_space<vmem>>, %arg5: memref<1x128xf32, #tpu.memory_space<vmem>>, %arg6: memref<8x128xf32, #tpu.memory_space<vmem>>) attributes {dimension_semantics = [#tpu.dimension_semantics<parallel>], iteration_bounds = array<i64: 2>, scalar_prefetch = 0 : i64, scratch_operands = 0 : i64, tpu.core_type = #tpu.core_type<tc>, window_params = [{transform_indices = @transform_0, window_bounds = array<i64: 8, 128>}, {pipeline_mode = #tpu.pipeline_mode<synchronous>, transform_indices = @transform_1, window_bounds = array<i64: 128, 128>}, {pipeline_mode = #tpu.pipeline_mode<synchronous>, transform_indices = @transform_2, window_bounds = array<i64: 1, 128>}, {pipeline_mode = #tpu.pipeline_mode<synchronous>, transform_indices = @transform_3, window_bounds = array<i64: 128, 128>}, {pipeline_mode = #tpu.pipeline_mode<synchronous>, transform_indices = @transform_4, window_bounds = array<i64: 1, 128>}, {transform_indices = @transform_5, window_bounds = array<i64: 8, 128>}]} {
    %c0 = arith.constant 0 : index
    %c0_0 = arith.constant 0 : index
    %0 = vector.load %arg1[%c0, %c0_0] : memref<8x128xf32, #tpu.memory_space<vmem>>, vector<8x128xf32>
    %1 = arith.truncf %0 : vector<8x128xf32> to vector<8x128xbf16>
    %c0_1 = arith.constant 0 : index
    %c0_2 = arith.constant 0 : index
    %2 = vector.load %arg2[%c0_1, %c0_2] : memref<128x128xbf16, #tpu.memory_space<vmem>>, vector<128x128xbf16>
    %cst = arith.constant dense<0.000000e+00> : vector<8x128xf32>
    %3 = tpu.matmul %1, %2, %cst {dimension_numbers = #tpu.dot_dimension_numbers<[1], [0], [0], [1], [0, 0, 1, 1], [], []>} : vector<8x128xbf16>, vector<128x128xbf16>, vector<8x128xf32> -> vector<8x128xf32>
    %c0_3 = arith.constant 0 : index
    %c0_4 = arith.constant 0 : index
    %4 = vector.load %arg3[%c0_3, %c0_4] : memref<1x128xf32, #tpu.memory_space<vmem>>, vector<1x128xf32>
    %5 = vector.broadcast %4 : vector<1x128xf32> to vector<8x128xf32>
    %6 = arith.addf %3, %5 : vector<8x128xf32>
    %cst_5 = arith.constant 5.000000e-01 : f32
    %7 = vector.broadcast %cst_5 : f32 to vector<8x128xf32>
    %8 = arith.mulf %7, %6 : vector<8x128xf32>
    %cst_6 = arith.constant 0.707106769 : f32
    %9 = vector.broadcast %cst_6 : f32 to vector<8x128xf32>
    %10 = arith.mulf %6, %9 : vector<8x128xf32>
    %cst_7 = arith.constant -4.000000e+00 : f32
    %cst_8 = arith.constant 4.000000e+00 : f32
    %11 = vector.broadcast %cst_7 : f32 to vector<8x128xf32>
    %12 = arith.maximumf %11, %10 : vector<8x128xf32>
    %13 = vector.broadcast %cst_8 : f32 to vector<8x128xf32>
    %14 = arith.minimumf %13, %12 : vector<8x128xf32>
    %15 = arith.mulf %14, %14 : vector<8x128xf32>
    %cst_9 = arith.constant -2.72614237E-10 : f32
    %16 = vector.broadcast %cst_9 : f32 to vector<8x128xf32>
    %17 = arith.mulf %16, %15 : vector<8x128xf32>
    %cst_10 = arith.constant 2.77068146E-8 : f32
    %18 = vector.broadcast %cst_10 : f32 to vector<8x128xf32>
    %19 = arith.addf %17, %18 : vector<8x128xf32>
    %20 = arith.mulf %19, %15 : vector<8x128xf32>
    %cst_11 = arith.constant -2.10102394E-6 : f32
    %21 = vector.broadcast %cst_11 : f32 to vector<8x128xf32>
    %22 = arith.addf %20, %21 : vector<8x128xf32>
    %23 = arith.mulf %22, %15 : vector<8x128xf32>
    %cst_12 = arith.constant -5.69250624E-5 : f32
    %24 = vector.broadcast %cst_12 : f32 to vector<8x128xf32>
    %25 = arith.addf %23, %24 : vector<8x128xf32>
    %26 = arith.mulf %25, %15 : vector<8x128xf32>
    %cst_13 = arith.constant -7.34990637E-4 : f32
    %27 = vector.broadcast %cst_13 : f32 to vector<8x128xf32>
    %28 = arith.addf %26, %27 : vector<8x128xf32>
    %29 = arith.mulf %28, %15 : vector<8x128xf32>
    %cst_14 = arith.constant -2.954600e-03 : f32
    %30 = vector.broadcast %cst_14 : f32 to vector<8x128xf32>
    %31 = arith.addf %29, %30 : vector<8x128xf32>
    %32 = arith.mulf %31, %15 : vector<8x128xf32>
    %cst_15 = arith.constant -0.0160960332 : f32
    %33 = vector.broadcast %cst_15 : f32 to vector<8x128xf32>
    %34 = arith.addf %32, %33 : vector<8x128xf32>
    %cst_16 = arith.constant -1.45660715E-5 : f32
    %35 = vector.broadcast %cst_16 : f32 to vector<8x128xf32>
    %36 = arith.mulf %35, %15 : vector<8x128xf32>
    %cst_17 = arith.constant -2.13374049E-4 : f32
    %37 = vector.broadcast %cst_17 : f32 to vector<8x128xf32>
    %38 = arith.addf %36, %37 : vector<8x128xf32>
    %39 = arith.mulf %38, %15 : vector<8x128xf32>
    %cst_18 = arith.constant -0.00168282702 : f32
    %40 = vector.broadcast %cst_18 : f32 to vector<8x128xf32>
    %41 = arith.addf %39, %40 : vector<8x128xf32>
    %42 = arith.mulf %41, %15 : vector<8x128xf32>
    %cst_19 = arith.constant -0.00737332925 : f32
    %43 = vector.broadcast %cst_19 : f32 to vector<8x128xf32>
    %44 = arith.addf %42, %43 : vector<8x128xf32>
    %45 = arith.mulf %44, %15 : vector<8x128xf32>
    %cst_20 = arith.constant -0.0142647391 : f32
    %46 = vector.broadcast %cst_20 : f32 to vector<8x128xf32>
    %47 = arith.addf %45, %46 : vector<8x128xf32>
    %48 = tpu.reciprocal %47 {approx = true} : vector<8x128xf32> -> vector<8x128xf32>
    %49 = arith.mulf %47, %48 : vector<8x128xf32>
    %cst_21 = arith.constant 2.000000e+00 : f32
    %50 = vector.broadcast %cst_21 : f32 to vector<8x128xf32>
    %51 = arith.subf %50, %49 : vector<8x128xf32>
    %52 = arith.mulf %48, %51 : vector<8x128xf32>
    %53 = arith.mulf %14, %34 : vector<8x128xf32>
    %54 = arith.mulf %53, %52 : vector<8x128xf32>
    %cst_22 = arith.constant 1.000000e+00 : f32
    %55 = vector.broadcast %cst_22 : f32 to vector<8x128xf32>
    %56 = arith.addf %55, %54 : vector<8x128xf32>
    %57 = arith.mulf %8, %56 : vector<8x128xf32>
    %58 = arith.truncf %57 : vector<8x128xf32> to vector<8x128xbf16>
    %c0_23 = arith.constant 0 : index
    %c0_24 = arith.constant 0 : index
    %59 = vector.load %arg4[%c0_23, %c0_24] : memref<128x128xbf16, #tpu.memory_space<vmem>>, vector<128x128xbf16>
    %cst_25 = arith.constant dense<0.000000e+00> : vector<8x128xf32>
    %60 = tpu.matmul %58, %59, %cst_25 {dimension_numbers = #tpu.dot_dimension_numbers<[1], [0], [0], [1], [0, 0, 1, 1], [], []>} : vector<8x128xbf16>, vector<128x128xbf16>, vector<8x128xf32> -> vector<8x128xf32>
    %c0_26 = arith.constant 0 : index
    %c0_27 = arith.constant 0 : index
    %61 = vector.load %arg5[%c0_26, %c0_27] : memref<1x128xf32, #tpu.memory_space<vmem>>, vector<1x128xf32>
    %62 = vector.broadcast %61 : vector<1x128xf32> to vector<8x128xf32>
    %63 = arith.addf %60, %62 : vector<8x128xf32>
    %c0_28 = arith.constant 0 : index
    %c0_29 = arith.constant 0 : index
    %64 = vector.load %arg6[%c0_28, %c0_29] : memref<8x128xf32, #tpu.memory_space<vmem>>, vector<8x128xf32>
    tpu.vector_store %arg6[%c0_28, %c0_29], %63 {strides = array<i32>} : memref<8x128xf32, #tpu.memory_space<vmem>>, vector<8x128xf32>,
    return
  }
  func.func @transform_0(%arg0: i32) -> (i32, i32) {
    %c0_i32 = arith.constant 0 : i32
    %c0_i32_0 = arith.constant 0 : i32
    return %arg0, %c0_i32 : i32, i32
  }
  func.func @transform_1(%arg0: i32) -> (i32, i32) {
    %c0_i32 = arith.constant 0 : i32
    %c0_i32_0 = arith.constant 0 : i32
    %c0_i32_1 = arith.constant 0 : i32
    return %c0_i32, %c0_i32_0 : i32, i32
  }
  func.func @transform_2(%arg0: i32) -> (i32, i32) {
    %c0_i32 = arith.constant 0 : i32
    %c0_i32_0 = arith.constant 0 : i32
    %c0_i32_1 = arith.constant 0 : i32
    return %c0_i32, %c0_i32_0 : i32, i32
  }
  func.func @transform_3(%arg0: i32) -> (i32, i32) {
    %c0_i32 = arith.constant 0 : i32
    %c0_i32_0 = arith.constant 0 : i32
    %c0_i32_1 = arith.constant 0 : i32
    return %c0_i32, %c0_i32_0 : i32, i32
  }
  func.func @transform_4(%arg0: i32) -> (i32, i32) {
    %c0_i32 = arith.constant 0 : i32
    %c0_i32_0 = arith.constant 0 : i32
    %c0_i32_1 = arith.constant 0 : i32
    return %c0_i32, %c0_i32_0 : i32, i32
  }
  func.func @transform_5(%arg0: i32) -> (i32, i32) {
    %c0_i32 = arith.constant 0 : i32
    %c0_i32_0 = arith.constant 0 : i32
    return %arg0, %c0_i32 : i32, i32
  }
}

</mosaic_0001>

<bundles_post_ra>
// kernel: _mlp_fused.1
= control target key start
LH: loop header
LB: loop body
LE: loop exit
PB: predicated region body
PF: predicated region fallthrough
CT: control target
= control target key end

     0   :  { %10 = vsyncpa [#allocation3], 0  ;;  %s940_s0 = inlined_call_operand.vmem [shape: f32[16,128], index: 0, kind: input, shape index: {}]   ;;  %s941_s1 = inlined_call_operand.hbm [shape: bf16[128,128], index: 1, kind: input, shape index: {}]   ;;  %s942_s2 = inlined_call_operand.vmem [shape: f32[1,128], index: 2, kind: input, shape index: {}]   ;;  %s943_s3 = inlined_call_operand.hbm [shape: bf16[128,128], index: 3, kind: input, shape index: {}]   ;;  %s944_s4 = inlined_call_operand.vmem [shape: f32[1,128], index: 4, kind: input, shape index: {}]   ;;  %s945_s5 = inlined_call_operand.vmem [shape: f32[16,128], index: 5, kind: output, shape index: {}]  }
   0x1   :  { %11 = vsyncpa [#allocation5], 0  ;;  %s834_s18 = smov 0  }
   0x2 LB: > { %s840_s19 = sadd.s32 4294967295, %s796_s18   ;;  %p587_p0 = scmp.ge.s32.totalorder %s796_s18, 1  ;;  %s796_s18 = sphi %s834_s18, %s17_s18  }
   0x3   : > { %p158_p1 = scmp.lt.s32.totalorder %s796_s18, 3  ;;  %s798_s20 = smov [#allocation2]  }
   0x4   : > { %s170_s21 = sshll.u32 %s798_s20, 4  ;;  %p946_p3 = scmp.eq.s32.totalorder %s840_s19, 0  ;;  %s171_s21 = int_to_ptr.vmem [resolvable:$true] %s170_s21 }
   0x5   : > { %p844_p2 = pnand %p587_p0, %p158_p1  ;;  %s799_s23 = smov [#allocation4]  }
   0x6   : > { %s186_s24 = sshll.u32 %s799_s23, 4  ;;  %s726_s28 = scalar_lea.hbm %s941_s1, 1024  ;;  %s857_s24 = int_to_ptr.vmem [resolvable:$true] %s186_s24 }
   0x7   : > { %s948_s22 = scalar_select %p844_p2, 1, 0 }
   0x8   : > { %p683_p4 = pneg %p844_p2  ;;  %p727_p6 = scmp.ne.s32.totalorder %s941_s1, %s726_s28 }
   0x9   : > { %p733_p10 = scmp.lt.u32.totalorder %s726_s28, %s941_s1 }
   0xa   : > { %p853_p5 = pnand %p946_p3, %p683_p4 }
   0xc   : > { %p728_p7 = pneg %p853_p5 }
   0xe   : > { %p729_p8 = pnand %p728_p7, %p727_p6 }
  0x10   : > { %p730_p9 = pneg %p729_p8 }
  0x12   : > { %p735_p11 = pnand %p733_p10, %p730_p9 }
  0x14   : > { %738 = shalt.err (!%p735_p11)
}
  0x15   : > { %s739_s8 = scalar_lea.vmem %s171_s21, 1024  ;;  %p747_p1 = scmp.lt.s32.totalorder %s171_s21, %s171_s21 }
  0x16   : > { %p740_p12 = scmp.ne.s32.totalorder %s171_s21, %s739_s8  ;;  %p748_p4 = scmp.lt.s32.totalorder %s739_s8, %s739_s8 }
  0x18   : > { %p742_p13 = pnand %p740_p12, %p728_p7  ;;  %p749_p3 = por %p748_p4, %p747_p1 }
  0x1a   : > { %p743_p0 = pneg %p742_p13 }
  0x1c   : > { %p750_p2 = pnand %p749_p3, %p743_p0 }
  0x1e   : > { %753 = shalt.err (!%p750_p2)
}
  0x1f   : > { %s800_s9 = smov 64   ;;  %s801_s10 = smov 4  }
  0x20   : > { %686 = dma.hbm_to_vmem [thread:$0]  (!%p853_p5), %s941_s1, 1024, %s171_s21, [#allocation3], %s800_s9, %s800_s9, %s801_s10  }
  0x21   : > { %s754_s15 = scalar_lea.hbm %s943_s3, 1024 }
  0x22   : > { %p755_p6 = scmp.ne.s32.totalorder %s943_s3, %s754_s15  ;;  %p761_p8 = scmp.lt.u32.totalorder %s754_s15, %s943_s3 }
  0x24   : > { %p757_p2 = pnand %p755_p6, %p728_p7 }
  0x26   : > { %p758_p3 = pneg %p757_p2 }
  0x28   : > { %p763_p9 = pnand %p761_p8, %p758_p3 }
  0x2a   : > { %766 = shalt.err (!%p763_p9)
}
  0x2b   : > { %s767_s21 = scalar_lea.vmem %s857_s24, 1024  ;;  %p775_p13 = scmp.lt.s32.totalorder %s857_s24, %s857_s24 }
  0x2c   : > { %p768_p10 = scmp.ne.s32.totalorder %s857_s24, %s767_s21  ;;  %p776_p0 = scmp.lt.s32.totalorder %s767_s21, %s767_s21 }
  0x2e   : > { %p770_p11 = pnand %p768_p10, %p728_p7  ;;  %p777_p1 = por %p776_p0, %p775_p13 }
  0x30   : > { %p771_p12 = pneg %p770_p11 }
  0x32   : > { %p778_p4 = pnand %p777_p1, %p771_p12 }
  0x34   : > { %781 = shalt.err (!%p778_p4)
}
  0x35   : > { %689 = dma.hbm_to_vmem [thread:$0]  (!%p853_p5), %s943_s3, 1024, %s857_s24, [#allocation5], %s800_s9, %s800_s9, %s801_s10  }
  0x36   : > { %p950_p6 = scmp.ne.s32.totalorder %s948_s22, 0 }
  0x37   : > { %p951_p2 = scmp.eq.s32.totalorder (!%p950_p6), %s840_s19, 0 }
  0x38   : > { %212 = sbr.rel (%p950_p6) target bundleno = 577 (0x241), region = 40 }
  0x3f   : > { %787 = dma.done.wait (%p951_p2), [#allocation3], 1024   ;;  %p952_p7 = pmov %p951_p2 }
  0x40   : > { %p953_p3 = pmov %p951_p2 }
  0x41   : > { %789 = vsyncadd (%p952_p7), [#allocation3], 4294966272 }
  0x42   : > { %791 = dma.done.wait (%p953_p3), [#allocation5], 1024   ;;  %p954_p8 = pmov %p951_p2 }
  0x43   : > { %v802_v0 = vmov 0.0   ;;  %vm803_vm0 = vmmov 0   ;;  %v708_v1 = vld [vmem:[#allocation2] sm:$0xff]   ;;  %v709_v2 = vld [vmem:[#allocation2 + $0x8] sm:$0xff]   ;;  %v710_v3 = vld [vmem:[#allocation2 + $0x10] sm:$0xff]   ;;  %p242_p5 = scmp.lt.s32.totalorder %s840_s19, 1 }
  0x44   : > { %793 = vsyncadd (%p954_p8), [#allocation5], 4294966272  ;;  %635 = vmatprep.subr.bf16.mxu0 %v802_v0  ;;  %651 = vmatprep.mubr.msk.bf16.mxu0 %vm803_vm0, %v802_v0  ;;  %v711_v4 = vld [vmem:[#allocation2 + $0x18] sm:$0xff]   ;;  %v712_v5 = vld [vmem:[#allocation2 + $0x20] sm:$0xff]  }
  0x45   : > { %655 = vmatprep.subr.bf16.mxu1 %v802_v0  ;;  %671 = vmatprep.mubr.msk.bf16.mxu1 %vm803_vm0, %v802_v0  ;;  %s956_s19 = smov (!%p242_p5, %s840_s19), 1  ;;  %v713_v6 = vld [vmem:[#allocation2 + $0x28] sm:$0xff]   ;;  %v714_v7 = vld [vmem:[#allocation2 + $0x30] sm:$0xff]   ;;  %v715_v8 = vld [vmem:[#allocation2 + $0x38] sm:$0xff]  }
  0x46   : > { %636 = vmatpush3.bf16.msra.mxu0 %v708_v1  ;;  %s594_s22 = sshll.u32 %s956_s19, 3  ;;  %v716_v11 = vld [vmem:[#allocation4] sm:$0xff]   ;;  %v717_v12 = vld [vmem:[#allocation4 + $0x8] sm:$0xff]   ;;  %v718_v13 = vld [vmem:[#allocation4 + $0x10] sm:$0xff]  }
  0x47   : > { %637 = vmatprep.subr.bf16.mxu0 %v802_v0  ;;  %s245_s28 = scalar_lea.vmem %s940_s0, %s594_s22  ;;  %656 = vmatpush3.bf16.msra.mxu1 %v716_v11  ;;  %v719_v14 = vld [vmem:[#allocation4 + $0x18] sm:$0xff]   ;;  %v720_v15 = vld [vmem:[#allocation4 + $0x20] sm:$0xff]   ;;  %v721_v16 = vld [vmem:[#allocation4 + $0x28] sm:$0xff]   ;;  %s249_s10 = scalar_lea.vmem %s945_s5, %s594_s22 }
  0x48   : > { %v251_v9 = vld [vmem:[%s245_s28] sm:$0xff]  ;;  %657 = vmatprep.subr.bf16.mxu1 %v802_v0  ;;  %v722_v17 = vld [vmem:[#allocation4 + $0x30] sm:$0xff]   ;;  %v723_v18 = vld [vmem:[#allocation4 + $0x38] sm:$0xff]  }
  0x49   : > { %v252_v10 = vpack.c.bf16 %v251_v9, %v251_v9  ;;  %v596_v19 = vld [vmem:[%s942_s2] ss:$0 sm:$0xff] }
  0x4a   : > { %638 = vmatpush3.bf16.msra.mxu0 %v709_v2  ;;  %v606_v58 = vld [vmem:[%s944_s4] ss:$0 sm:$0xff] }
  0x4b   : > { %639 = vmatprep.subr.bf16.mxu0 %v802_v0  ;;  %658 = vmatpush3.bf16.msra.mxu1 %v717_v12 }
  0x4c   : > { %659 = vmatprep.subr.bf16.mxu1 %v802_v0 }
  0x4e   : > { %640 = vmatpush3.bf16.msra.mxu0 %v710_v3 }
  0x4f   : > { %641 = vmatprep.subr.bf16.mxu0 %v802_v0  ;;  %660 = vmatpush3.bf16.msra.mxu1 %v718_v13 }
  0x50   : > { %661 = vmatprep.subr.bf16.mxu1 %v802_v0 }
  0x52   : > { %642 = vmatpush3.bf16.msra.mxu0 %v711_v4 }
  0x53   : > { %643 = vmatprep.subr.bf16.mxu0 %v802_v0  ;;  %662 = vmatpush3.bf16.msra.mxu1 %v719_v14 }
  0x54   : > { %663 = vmatprep.subr.bf16.mxu1 %v802_v0 }
  0x56   : > { %644 = vmatpush3.bf16.msra.mxu0 %v712_v5 }
  0x57   : > { %645 = vmatprep.subr.bf16.mxu0 %v802_v0  ;;  %664 = vmatpush3.bf16.msra.mxu1 %v720_v15 }
  0x58   : > { %665 = vmatprep.subr.bf16.mxu1 %v802_v0 }
  0x5a   : > { %646 = vmatpush3.bf16.msra.mxu0 %v713_v6 }
  0x5b   : > { %647 = vmatprep.subr.bf16.mxu0 %v802_v0  ;;  %666 = vmatpush3.bf16.msra.mxu1 %v721_v16 }
  0x5c   : > { %667 = vmatprep.subr.bf16.mxu1 %v802_v0 }
  0x5e   : > { %648 = vmatpush3.bf16.msra.mxu0 %v714_v7 }
  0x5f   : > { %649 = vmatprep.subr.bf16.mxu0 %v802_v0  ;;  %668 = vmatpush3.bf16.msra.mxu1 %v722_v17 }
  0x60   : > { %669 = vmatprep.subr.bf16.mxu1 %v802_v0 }
  0x62   : > { %650 = vmatpush3.bf16.msra.mxu0 %v715_v8 }
  0x63   : > { %670 = vmatpush3.bf16.msra.mxu1 %v723_v18 }
  0x65   : > { %652 = vmatmul.mubr.bf16.vlgmr.msra.gmra.mrb[0].mxu0 %v252_v10 }
 0x138   : > { %v358_v20 = vpop.f32.mrb[0].mxu0 }
 0x139   : > { %v359_v21 = vadd.f32 %v596_v19, %v358_v20  ;;  %v653_v22 = vpop.f32.mrb[1].mxu0 }
 0x13a   : > { %v361_v23 = vpop.f32.mrb[2].mxu0 }
 0x13b   : > { %v365_v24 = vmul.f32 0.70710677, %v359_v21  ;;  %v654_v25 = vpop.f32.mrb[3].mxu0  ;;  %v364_v54 = vmul.f32 0.5, %v359_v21 }
 0x13d   : > { %v605_v26 = vclamps-f32 %v365_v24, 4.0 }
 0x13f   : > { %v368_v27 = vmul.f32 %v605_v26, %v605_v26 }
 0x141   : > { %v369_v28 = vmul.f32 -2.7261424e-10, %v368_v27  ;;  %v381_v29 = vmul.f32 -1.45660715e-05, %v368_v27 }
 0x143   : > { %v370_v30 = vadd.f32 2.7706815e-08, %v369_v28  ;;  %v382_v31 = vadd.f32 -0.00021337405, %v381_v29 }
 0x145   : > { %v371_v32 = vmul.f32 %v370_v30, %v368_v27  ;;  %v383_v33 = vmul.f32 %v382_v31, %v368_v27 }
 0x147   : > { %v372_v34 = vadd.f32 -2.101024e-06, %v371_v32  ;;  %v384_v35 = vadd.f32 -0.001682827, %v383_v33 }
 0x149   : > { %v373_v36 = vmul.f32 %v372_v34, %v368_v27  ;;  %v385_v37 = vmul.f32 %v384_v35, %v368_v27 }
 0x14b   : > { %v374_v38 = vadd.f32 -5.6925062e-05, %v373_v36  ;;  %v386_v39 = vadd.f32 -0.0073733293, %v385_v37 }
 0x14d   : > { %v375_v40 = vmul.f32 %v374_v38, %v368_v27  ;;  %v387_v41 = vmul.f32 %v386_v39, %v368_v27 }
 0x14f   : > { %v376_v42 = vadd.f32 -0.00073499064, %v375_v40  ;;  %v388_v43 = vadd.f32 -0.014264739, %v387_v41 }
 0x151   : > { %v377_v44 = vmul.f32 %v376_v42, %v368_v27  ;;  %724 = vrcp.f32 %v388_v43 }
 0x153   : > { %v378_v45 = vadd.f32 -0.0029546, %v377_v44 }
 0x155   : > { %v379_v46 = vmul.f32 %v378_v45, %v368_v27 }
 0x157   : > { %v380_v48 = vadd.f32 -0.016096033, %v379_v46 }
 0x159   : > { %v393_v51 = vmul.f32 %v605_v26, %v380_v48 }
 0x15b   : > { %v725_v47 = vpop.eup %724 }
 0x15c   : > { %v390_v49 = vmul.f32 %v725_v47, %v388_v43 }
 0x15e   : > { %v391_v50 = vsub.f32 2.0, %v390_v49 }
 0x160   : > { %v392_v52 = vmul.f32 %v725_v47, %v391_v50 }
 0x162   : > { %v394_v53 = vmul.f32 %v393_v51, %v392_v52 }
 0x164   : > { %v395_v55 = vadd.f32 1.0, %v394_v53 }
 0x166   : > { %v396_v56 = vmul.f32 %v395_v55, %v364_v54 }
 0x168   : > { %v397_v57 = vpack.c.bf16 %v396_v56, %v396_v56 }
 0x16a   : > { %672 = vmatmul.mubr.bf16.vlgmr.msra.gmra.mrb[0].mxu1 %v397_v57 }
 0x23d   : > { %v503_v59 = vpop.f32.mrb[0].mxu1 }
 0x23e   : > { %v504_v60 = vadd.f32 %v606_v58, %v503_v59  ;;  %v673_v61 = vpop.f32.mrb[1].mxu1 }
 0x23f   : > { %v506_v62 = vpop.f32.mrb[2].mxu1 }
 0x240   : > { %509 = vst [vmem:[%s249_s10] sm:$0xff] %v504_v60  ;;  %v674_v63 = vpop.f32.mrb[3].mxu1 }
 0x241 PF: > { %s17_s18 = sadd.s32 1, %s796_s18  }
 0x242   : > { %p14_p9 = scmp.ge.s32.totalorder %s17_s18, 4  }
 0x244   :  { %16 = sbr.rel (!%p14_p9) target bundleno = 2 (0x2), region = 79 }
 0x24b   :  { %529 = vsyncpa [#allocation3], 1 }
 0x24c   :  { %531 = vsyncpa [#allocation3 + $0x1], 1 }
 0x24d   :  { %532 = vsyncpa [#allocation5], 1 }

</bundles_post_ra>
